<compile_context>
chip_gen: v6e
topology: v6e:2x2x1
jax: 0.10.0
libtpu: 0.0.40
codegen_flags: <defaults>
</compile_context>

<pallas_src>
import jax
import jax.numpy as jnp
from jax.experimental import pallas as pl
from jax.experimental.pallas import tpu as pltpu

LANE = 128           # vreg lane width: last dim of x/out tiles must be a multiple of this
DEFAULT_TILE = 65536 # lanes per grid step (~8 MiB of double-buffered VMEM in f32)
MAX_TILE = 131072    # hard cap (~16-17 MiB double-buffered) -> safe on v5e/v6e/v7x


def _round_up(v: int, m: int) -> int:
    return ((v + m - 1) // m) * m


def _mlp_kernel(x_ref, w1_ref, b1_ref, w2_ref, b2_ref, o_ref):
    # x_ref: (input_dim, TILE) -- batch along lanes, every intermediate lane-dense.
    h = jnp.dot(w1_ref[...], x_ref[...], preferred_element_type=jnp.float32)   # (H, TILE)
    h = jnp.maximum(h + b1_ref[...], 0.0)                                      # ReLU; b1 (H,1) broadcasts over lanes
    z = jnp.dot(w2_ref[...], h, preferred_element_type=jnp.float32)            # (1, TILE)
    o_ref[...] = jax.nn.sigmoid(z + b2_ref[...]).astype(o_ref.dtype)           # sigmoid -> EUP (free slot)


def link_predictor_forward(x, w1, b1, w2, b2, *, tile=DEFAULT_TILE,
                           feature_major=False, x_bf16=False):
    """LinkPredictor forward.

    x : (N, input_dim) f32  (PyTorch layout), or (input_dim, N) if feature_major=True.
    w1: (hidden, input_dim) f32   b1: (hidden, 1) f32   <- PyTorch (hidden,) bias must be
    w2: (1, hidden)        f32    b2: (1, 1)      f32      reshaped to a column vector.
    Returns (N, 1) f32 in [0, 1].
    """
    if feature_major:
        d, n = x.shape
    else:
        n, d = x.shape
    hdim = w1.shape[0]

    # --- tile selection -------------------------------------------------------------
    # Defensive: tile must be a positive multiple of LANE, capped for VMEM safety.
    tile = max(LANE, min(int(tile), MAX_TILE))
    tile = (tile // LANE) * LANE

    n_lanes = _round_up(n, LANE)
    if n_lanes >= 2 * LANE:
        # Prefer >= 2 grid steps so v7x can shard the parallel batch axis over both TCs.
        two_step = _round_up((n_lanes + 1) // 2, LANE)
        tile_n = min(tile, two_step)
    else:
        tile_n = n_lanes
    tile_n = max(LANE, (tile_n // LANE) * LANE)
    n_pad = _round_up(n, tile_n)
    grid = (n_pad // tile_n,)

    # --- wrapper-side layout plumbing -----------------------------------------------
    if feature_major:
        xt = x                                        # already (input_dim, N): no extra HBM pass
    else:
        # TODO(synk): have the upstream producer emit (input_dim, N) to remove this HBM pass.
        xt = jnp.transpose(x)                         # (input_dim, N)
    if x_bf16:
        xt = xt.astype(jnp.bfloat16)                  # halves the dominant read stream
        w1 = w1.astype(jnp.bfloat16)                  # tiny, VMEM-resident; keeps dot dtypes matched
    if n_pad != n:
        xt = jnp.pad(xt, ((0, 0), (0, n_pad - n)))    # zero-padded tail is sliced off below

    # --- explicit VMEM budget --------------------------------------------------------
    # Per step: x buffer ~32 B/lane (7 rows pad to a full sublane tile), out buffer
    # ~32 B/lane (1 row pads to 8 sublanes); x2 for double buffering => ~128 B/lane.
    vmem_bytes = 128 * tile_n + (4 << 20)             # + weights / pipeline headroom
    vmem_bytes = min(int(vmem_bytes), 64 << 20)       # never above v7x physical VMEM

    x_itemsize = jnp.dtype(xt.dtype).itemsize
    cost = pl.CostEstimate(
        flops=2 * n_pad * (d * hdim + hdim),
        transcendentals=n_pad,
        bytes_accessed=n_pad * (d * x_itemsize + 4)
        + (w1.size + b1.size + w2.size + b2.size) * 4,
    )

    const = lambda i: (0, 0)  # weights/biases: same block every step -> resident in VMEM
    out_t = pl.pallas_call(
        _mlp_kernel,
        out_shape=jax.ShapeDtypeStruct((1, n_pad), jnp.float32),
        grid=grid,
        in_specs=[
            pl.BlockSpec((d, tile_n), lambda i: (0, i)),        # stream x tiles from HBM
            pl.BlockSpec((hdim, d), const),                     # w1 (16, 7)
            pl.BlockSpec((hdim, 1), const),                     # b1 (16, 1)
            pl.BlockSpec((1, hdim), const),                     # w2 (1, 16)
            pl.BlockSpec((1, 1), const),                        # b2 (1, 1)
        ],
        out_specs=pl.BlockSpec((1, tile_n), lambda i: (0, i)),  # lane-dense output tile
        compiler_params=pltpu.CompilerParams(
            dimension_semantics=("parallel",),                  # batch tiles across TCs (v7x)
            vmem_limit_bytes=vmem_bytes,
        ),
        cost_estimate=cost,
    )(xt, w1, b1, w2, b2)

    return jnp.transpose(out_t[:, :n])                # back to the public (N, 1) shape


def init_params(key, input_dim=7, hidden_dim=16):
    """Deterministic init mimicking torch.nn.Linear default U(-1/sqrt(fan_in), 1/sqrt(fan_in)).

    Weights in torch's (out, in) layout; biases as column vectors for lane broadcast.
    """
    k1, k2, k3, k4 = jax.random.split(key, 4)
    bound1 = 1.0 / jnp.sqrt(input_dim)
    bound2 = 1.0 / jnp.sqrt(hidden_dim)
    w1 = jax.random.uniform(k1, (hidden_dim, input_dim), jnp.float32, -bound1, bound1)
    b1 = jax.random.uniform(k2, (hidden_dim, 1), jnp.float32, -bound1, bound1)
    w2 = jax.random.uniform(k3, (1, hidden_dim), jnp.float32, -bound2, bound2)
    b2 = jax.random.uniform(k4, (1, 1), jnp.float32, -bound2, bound2)
    return w1, b1, w2, b2


if __name__ == "__main__":
    input_dim, hidden_dim = 7, 16

    key = jax.random.PRNGKey(0)
    kx, kp, kx2 = jax.random.split(key, 3)
    w1, b1, w2, b2 = init_params(kp, input_dim, hidden_dim)

    def ref_fwd(x):
        # Same math as torch: sigmoid(relu(x @ W1^T + b1) @ W2^T + b2)
        return jax.nn.sigmoid(jnp.maximum(x @ w1.T + b1.T, 0.0) @ w2.T + b2.T)

    # Small batch (single 128-lane tile).
    x_small = jax.random.normal(kx, (8, input_dim), jnp.float32)
    out_small = jax.block_until_ready(link_predictor_forward(x_small, w1, b1, w2, b2))
    assert out_small.shape == (8, 1)
    assert jnp.allclose(out_small, ref_fwd(x_small), atol=1e-5, rtol=1e-5)

    # Ragged batch + multi-step grid (small tile override exercises padding & pipelining).
    x_rag = jax.random.normal(kx2, (300, input_dim), jnp.float32)
    out_rag = jax.block_until_ready(
        link_predictor_forward(x_rag, w1, b1, w2, b2, tile=128))
    assert out_rag.shape == (300, 1)
    assert jnp.allclose(out_rag, ref_fwd(x_rag), atol=1e-5, rtol=1e-5)

    print("KERNEL_OK")
</pallas_src>

<mosaic_0001>
module attributes {stable_mosaic.version = 11 : i64} {
  func.func @_mlp_kernel(%arg0: i32, %arg1: memref<7x128xf32, #tpu.memory_space<vmem>>, %arg2: memref<16x7xf32, #tpu.memory_space<vmem>>, %arg3: memref<16x1xf32, #tpu.memory_space<vmem>>, %arg4: memref<1x16xf32, #tpu.memory_space<vmem>>, %arg5: memref<1x1xf32, #tpu.memory_space<vmem>>, %arg6: memref<1x128xf32, #tpu.memory_space<vmem>>) attributes {dimension_semantics = [#tpu.dimension_semantics<parallel>], iteration_bounds = array<i64: 1>, scalar_prefetch = 0 : i64, scratch_operands = 0 : i64, tpu.core_type = #tpu.core_type<tc>, window_params = [{transform_indices = @transform_0, window_bounds = array<i64: 7, 128>}, {pipeline_mode = #tpu.pipeline_mode<synchronous>, transform_indices = @transform_1, window_bounds = array<i64: 16, 7>}, {pipeline_mode = #tpu.pipeline_mode<synchronous>, transform_indices = @transform_2, window_bounds = array<i64: 16, 1>}, {pipeline_mode = #tpu.pipeline_mode<synchronous>, transform_indices = @transform_3, window_bounds = array<i64: 1, 16>}, {pipeline_mode = #tpu.pipeline_mode<synchronous>, transform_indices = @transform_4, window_bounds = array<i64: 1, 1>}, {transform_indices = @transform_5, window_bounds = array<i64: 1, 128>}]} {
    %c0 = arith.constant 0 : index
    %c0_0 = arith.constant 0 : index
    %0 = vector.load %arg2[%c0, %c0_0] : memref<16x7xf32, #tpu.memory_space<vmem>>, vector<16x7xf32>
    %c0_1 = arith.constant 0 : index
    %c0_2 = arith.constant 0 : index
    %1 = vector.load %arg1[%c0_1, %c0_2] : memref<7x128xf32, #tpu.memory_space<vmem>>, vector<7x128xf32>
    %cst = arith.constant dense<0.000000e+00> : vector<16x128xf32>
    %2 = tpu.matmul %0, %1, %cst {dimension_numbers = #tpu.dot_dimension_numbers<[1], [0], [0], [1], [0, 0, 1, 1], [], []>} : vector<16x7xf32>, vector<7x128xf32>, vector<16x128xf32> -> vector<16x128xf32>
    %c0_3 = arith.constant 0 : index
    %c0_4 = arith.constant 0 : index
    %3 = vector.load %arg3[%c0_3, %c0_4] : memref<16x1xf32, #tpu.memory_space<vmem>>, vector<16x1xf32>
    %4 = vector.broadcast %3 : vector<16x1xf32> to vector<16x128xf32>
    %5 = arith.addf %2, %4 : vector<16x128xf32>
    %cst_5 = arith.constant 0.000000e+00 : f32
    %6 = vector.broadcast %cst_5 : f32 to vector<16x128xf32>
    %7 = arith.maximumf %5, %6 : vector<16x128xf32>
    %c0_6 = arith.constant 0 : index
    %c0_7 = arith.constant 0 : index
    %8 = vector.load %arg4[%c0_6, %c0_7] : memref<1x16xf32, #tpu.memory_space<vmem>>, vector<1x16xf32>
    %cst_8 = arith.constant dense<0.000000e+00> : vector<1x128xf32>
    %9 = tpu.matmul %8, %7, %cst_8 {dimension_numbers = #tpu.dot_dimension_numbers<[1], [0], [0], [1], [0, 0, 1, 1], [], []>} : vector<1x16xf32>, vector<16x128xf32>, vector<1x128xf32> -> vector<1x128xf32>
    %c0_9 = arith.constant 0 : index
    %c0_10 = arith.constant 0 : index
    %10 = vector.load %arg5[%c0_9, %c0_10] : memref<1x1xf32, #tpu.memory_space<vmem>>, vector<1x1xf32>
    %11 = vector.broadcast %10 : vector<1x1xf32> to vector<1x128xf32>
    %12 = arith.addf %9, %11 : vector<1x128xf32>
    %13 = arith.negf %12 : vector<1x128xf32>
    %14 = math.exp %13 : vector<1x128xf32>
    %cst_11 = arith.constant 1.000000e+00 : f32
    %15 = vector.broadcast %cst_11 : f32 to vector<1x128xf32>
    %16 = arith.addf %15, %14 : vector<1x128xf32>
    %17 = arith.divf %15, %16 : vector<1x128xf32>
    %c0_12 = arith.constant 0 : index
    %c0_13 = arith.constant 0 : index
    %18 = vector.load %arg6[%c0_12, %c0_13] : memref<1x128xf32, #tpu.memory_space<vmem>>, vector<1x128xf32>
    tpu.vector_store %arg6[%c0_12, %c0_13], %17 {strides = array<i32>} : memref<1x128xf32, #tpu.memory_space<vmem>>, vector<1x128xf32>,
    return
  }
  func.func @transform_0(%arg0: i32) -> (i32, i32) {
    %c0_i32 = arith.constant 0 : i32
    %c0_i32_0 = arith.constant 0 : i32
    return %c0_i32, %arg0 : i32, i32
  }
  func.func @transform_1(%arg0: i32) -> (i32, i32) {
    %c0_i32 = arith.constant 0 : i32
    %c0_i32_0 = arith.constant 0 : i32
    %c0_i32_1 = arith.constant 0 : i32
    return %c0_i32, %c0_i32_0 : i32, i32
  }
  func.func @transform_2(%arg0: i32) -> (i32, i32) {
    %c0_i32 = arith.constant 0 : i32
    %c0_i32_0 = arith.constant 0 : i32
    %c0_i32_1 = arith.constant 0 : i32
    return %c0_i32, %c0_i32_0 : i32, i32
  }
  func.func @transform_3(%arg0: i32) -> (i32, i32) {
    %c0_i32 = arith.constant 0 : i32
    %c0_i32_0 = arith.constant 0 : i32
    %c0_i32_1 = arith.constant 0 : i32
    return %c0_i32, %c0_i32_0 : i32, i32
  }
  func.func @transform_4(%arg0: i32) -> (i32, i32) {
    %c0_i32 = arith.constant 0 : i32
    %c0_i32_0 = arith.constant 0 : i32
    %c0_i32_1 = arith.constant 0 : i32
    return %c0_i32, %c0_i32_0 : i32, i32
  }
  func.func @transform_5(%arg0: i32) -> (i32, i32) {
    %c0_i32 = arith.constant 0 : i32
    %c0_i32_0 = arith.constant 0 : i32
    return %c0_i32, %arg0 : i32, i32
  }
}

</mosaic_0001>

<bundles_post_ra>
// kernel: tpu_custom_call.1
= control target key start
LH: loop header
LB: loop body
LE: loop exit
PB: predicated region body
PF: predicated region fallthrough
CT: control target
= control target key end

     0   :  { %s345_s0 = inlined_call_operand.vmem [shape: f32[7,128], index: 0, kind: input, shape index: {}]   ;;  %s346_s1 = inlined_call_operand.vmem [shape: f32[16,7], index: 1, kind: input, shape index: {}]   ;;  %s347_s2 = inlined_call_operand.vmem [shape: f32[16,1], index: 2, kind: input, shape index: {}]   ;;  %s348_s3 = inlined_call_operand.vmem [shape: f32[1,16], index: 3, kind: input, shape index: {}]   ;;  %s349_s4 = inlined_call_operand.<no memory space> [shape: f32[1,1], index: 4, kind: input, shape index: {}]   ;;  %s350_s5 = inlined_call_operand.hbm [shape: f32[1,128], index: 5, kind: output, shape index: {}]  }
   0x1   :  { %v10_v0 = vstv %s349_s4 }
   0x2   :  { %11 = vst [vmem:[#allocation2] sm:$0x1] %v10_v0 }
   0x3   :  { %v25_v1 = vld [vmem:[%s345_s0] sm:$0x7f]  ;;  %vm45_vm0 = vcmask 1046528   ;;  %vm38_vm1 = vcmask 56320   ;;  %v24_v3 = vld [vmem:[%s346_s1 + $0x8] sm:$0xff] }
   0x4   :  { %v23_v2 = vld [vmem:[%s346_s1] sm:$0xff]  ;;  %243 = vmatprep.subr.msk.mxu0 %vm45_vm0, %v25_v1  ;;  %v27_v4 = vld [vmem:[%s347_s2 + $0x8] sm:$0xff] }
   0x5   :  { %245 = vmatprep.mubr.msk.f32.mxu0 %vm38_vm1, %v23_v2 }
   0x6   :  { %12 = vsyncpa [#allocation4], 0  ;;  %244 = vmatpush3.msk.msra.mxu0 %vm45_vm0, %v25_v1  ;;  %v287_v5 = vmov 0   ;;  %v26_v6 = vld [vmem:[%s347_s2] sm:$0xff]  ;;  %v288_v7 = vmov 0.0   ;;  %vm289_vm2 = vmmov 0   ;;  %v133_v18 = vlaneseq }
   0x7   :  { %259 = vset.pattern.permute.xlu0 %v287_v5  ;;  %246 = vmatmul.mubr.msk.f32.vlgmr.msra.gmra.mxu0 %vm38_vm1, %v24_v3  ;;  %v126_v17 = vld [vmem:[%s348_s3] sm:$0x1]  ;;  %vm137_vm3 = vcmask 130048   ;;  %s290_s2 = smov [#allocation3]  }
   0x8   :  { %35 = vperm.xlu0 %259, %v27_v4   ;;  %260 = vset.pattern.permute.xlu1 %v287_v5  ;;  %v134_v19 = vshrl.u32 %v133_v18, 7  ;;  %s224_s29 = sshll.u32 %s290_s2, 4  ;;  %s225_s29 = int_to_ptr.vmem [resolvable:$true] %s224_s29 }
   0x9   :  { %248 = vmatprep.subr.mxu1 %v288_v7  ;;  %252 = vmatprep.mubr.msk.f32.mxu1 %vm289_vm2, %v288_v7  ;;  %v127_v8 = vld [vmem:[#allocation2] sm:$0x1]  ;;  %s265_s3 = scalar_lea.vmem %s225_s29, 16  ;;  %s269_s30 = scalar_lea.vmem %s225_s29, 32 }
   0xa   :  { %130 = vperm.xlu1 %260, %v127_v8   ;;  %v135_v20 = vsub.s32 0, %v134_v19  ;;  %p266_p0 = scmp.ne.s32.totalorder %s225_s29, %s265_s3  ;;  %p270_p1 = scmp.lt.s32.totalorder %s225_s29, %s225_s29 }
   0xb   :  { %p271_p2 = scmp.lt.s32.totalorder %s269_s30, %s265_s3 }
   0xc   :  { %30 = vperm.xlu0 %259, %v26_v6  }
   0xd   :  { %p272_p3 = por %p271_p2, %p270_p1 }
   0xf   :  { %p273_p4 = pnand %p272_p3, %p266_p0 }
  0x83   :  { %v36_v9 = vpop.permute.xlu0 %35 }
  0x85   :  { %v131_v21 = vpop.permute.xlu1 %130 }
  0x86   :  { %v136_v22 = vrot.slane %v131_v21, %v135_v20 }
  0x87   :  { %v31_v12 = vpop.permute.xlu0 %30 }
  0xc7   :  { %v247_v10 = vpop.f32.mrf.mxu0 }
  0xc8   :  { %v121_v11 = vadd.f32 %v247_v10, %v36_v9 }
  0xc9   :  { %v115_v13 = vpop.f32.mrf.mxu0 }
  0xca   :  { %v125_v14 = vmax.f32 %v121_v11, 0.0  ;;  %v116_v15 = vadd.f32 %v115_v13, %v31_v12 }
  0xcc   :  { %v124_v16 = vmax.f32 %v116_v15, 0.0  ;;  %249 = vmatpush3.msra.mxu1 %v125_v14 }
  0xcd   :  { %250 = vmatprep.subr.mxu1 %v288_v7 }
  0xce   :  { %251 = vmatpush3.msra.mxu1 %v124_v16 }
  0xcf   :  { %253 = vmatmul.mubr.msk.f32.vlgmr.msra.gmra.mxu1 %vm137_vm3, %v126_v17 }
 0x18f   :  { %v207_v23 = vpop.f32.mrf.mxu1 }
 0x190   :  { %v208_v24 = vadd.f32 %v207_v23, %v136_v22 }
 0x191   :  { %v254_v25 = vpop.f32.mrf.mxu1 }
 0x192   :  { %v236_v26 = vmul.f32 -1.442695, %v208_v24 }
 0x194   :  { %261 = vpow2.f32 %v236_v26 }
 0x1a1   :  { %v262_v27 = vpop.eup %261 }
 0x1a2   :  { %v214_v28 = vadd.f32 1.0, %v262_v27 }
 0x1a4   :  { %263 = vrcp.f32 %v214_v28 }
 0x1b1   :  { %v264_v29 = vpop.eup %263 }
 0x1b2   :  { %217 = vst [vmem:[#allocation3] sm:$0x1] %v264_v29 }
 0x1b3   :  { %276 = shalt.err (!%p273_p4)
}
 0x1b4   :  { %227 = dma.vmem_to_hbm [thread:$0]  %s225_s29, 16, %s350_s5, [#allocation4]  }
 0x1b5   :  { %285 = dma.done.wait [#allocation4], 16  }
 0x1b6   :  { %286 = vsyncadd [#allocation4], 4294967280 }
 0x1b7   :  { %231 = vsyncpa [#allocation4], 1 }

</bundles_post_ra>
